<compile_context>
chip_gen: v5e
topology: v5e:2x2
jax: 0.10.0
libtpu: 0.0.40
codegen_flags: <defaults>
</compile_context>

<pallas_src>
import jax
import jax.numpy as jnp
from jax.experimental import pallas as pl
from jax.experimental.pallas import tpu as pltpu

LANES = 128


def gain_table_kernel(neutral_ref, table_ref, idx_ref, out_ref):
    # neutral_ref: SMEM (1,)            int32  -- neutral image index
    # table_ref:   SMEM (num_images,)   f32    -- log2-gain table (tiny)
    # idx_ref:     VMEM (block_rows,128) int32 -- image indices to look up
    # out_ref:     VMEM (block_rows,128) f32   -- 2^(table[idx] - table[neutral])
    num_images = table_ref.shape[0]
    idx = idx_ref[...]

    # Neutral gain: one dynamic scalar read straight from SMEM.
    neutral_gain = table_ref[neutral_ref[0]]

    # Gather via unrolled VPU select-accumulate over the (static, tiny) table:
    # one compare+select per table entry; no one-hot, no MXU, no XLU reduce.
    acc = jnp.zeros(idx.shape, dtype=jnp.float32)
    for k in range(num_images):
        val_k = table_ref[k] - neutral_gain          # scalar (SMEM reads/sub)
        acc = jnp.where(idx == k, val_k, acc)        # VPU select

    out_ref[...] = jnp.exp2(acc)                     # EUP transcendental


def gain_table_forward(table_weight, x_idx, neutral_idx, *, max_block_rows=512):
    """table_weight: (num_images, 1) f32; x_idx: (N,) int; neutral_idx: scalar int.

    Returns (N, 1) float32, matching gain_table.forward(x, neutral_idx).
    """
    table_weight = jnp.asarray(table_weight, jnp.float32)
    num_images = table_weight.shape[0]
    tbl = table_weight.reshape(num_images)           # 1-D for SMEM

    x_flat = jnp.asarray(x_idx, jnp.int32).reshape(-1)
    n = x_flat.shape[0]
    nscal = jnp.asarray(neutral_idx, jnp.int32).reshape(1)

    # Lane-dense layout: pad N and fold it into (rows, 128) so stores are
    # full-lane vst instead of masked last-dim-1 partial stores.
    rows_needed = pl.cdiv(n, LANES)
    block_rows = min(max_block_rows, max(8, pl.next_power_of_2(rows_needed)))
    padded_rows = pl.cdiv(rows_needed, block_rows) * block_rows
    padded_n = padded_rows * LANES

    idx2d = jnp.pad(x_flat, (0, padded_n - n)).reshape(padded_rows, LANES)

    grid = (padded_rows // block_rows,)

    out2d = pl.pallas_call(
        gain_table_kernel,
        out_shape=jax.ShapeDtypeStruct((padded_rows, LANES), jnp.float32),
        grid=grid,
        in_specs=[
            pl.BlockSpec(memory_space=pltpu.MemorySpace.SMEM),    # neutral_idx
            pl.BlockSpec(memory_space=pltpu.MemorySpace.SMEM),    # table
            pl.BlockSpec((block_rows, LANES), lambda i: (i, 0)),  # indices
        ],
        out_specs=pl.BlockSpec((block_rows, LANES), lambda i: (i, 0)),
        compiler_params=pltpu.CompilerParams(
            dimension_semantics=("parallel",)),
    )(nscal, tbl, idx2d)

    return out2d.reshape(padded_n)[:n].reshape(n, 1)


if __name__ == "__main__":
    key = jax.random.PRNGKey(0)

    num_images = 8   # small num_images (the "exposures" table)
    N = 8            # number of indices looked up in one forward call

    # Deterministic parameter init: corresponds to the `exposures is not None`
    # branch of __init__ (nonzero log2-gain table).
    k_tbl, k_idx = jax.random.split(key)
    table_weight = jax.random.normal(k_tbl, (num_images, 1), dtype=jnp.float32) * 0.5

    x_idx = jax.random.randint(k_idx, (N,), 0, num_images, dtype=jnp.int32)
    neutral_idx = 3

    out = gain_table_forward(table_weight, x_idx, neutral_idx)
    out = jax.block_until_ready(out)

    # Pure-JAX reference check (same math as the PyTorch forward).
    ref = jnp.exp2(table_weight[x_idx] - table_weight[neutral_idx])
    assert out.shape == (N, 1)
    assert jnp.allclose(out, ref, atol=1e-6, rtol=1e-6)

    # Larger, non-multiple-of-128 N to exercise the blocked grid path.
    N2 = 3000
    x2 = jax.random.randint(jax.random.PRNGKey(1), (N2,), 0, num_images,
                            dtype=jnp.int32)
    out2 = jax.block_until_ready(
        gain_table_forward(table_weight, x2, neutral_idx, max_block_rows=8))
    ref2 = jnp.exp2(table_weight[x2] - table_weight[neutral_idx])
    assert out2.shape == (N2, 1)
    assert jnp.allclose(out2, ref2, atol=1e-6, rtol=1e-6)

    print("KERNEL_OK")
</pallas_src>

<mosaic_0001>
module attributes {stable_mosaic.version = 11 : i64} {
  func.func @gain_table_kernel(%arg0: i32, %arg1: memref<1xi32, #tpu.memory_space<smem>>, %arg2: memref<8xf32, #tpu.memory_space<smem>>, %arg3: memref<8x128xi32, #tpu.memory_space<vmem>>, %arg4: memref<8x128xf32, #tpu.memory_space<vmem>>) attributes {dimension_semantics = [#tpu.dimension_semantics<parallel>], iteration_bounds = array<i64: 1>, scalar_prefetch = 0 : i64, scratch_operands = 0 : i64, tpu.core_type = #tpu.core_type<tc>, window_params = [{transform_indices = @transform_0, window_bounds = array<i64: 1>}, {transform_indices = @transform_1, window_bounds = array<i64: 8>}, {transform_indices = @transform_2, window_bounds = array<i64: 8, 128>}, {transform_indices = @transform_3, window_bounds = array<i64: 8, 128>}]} {
    %c0 = arith.constant 0 : index
    %c0_0 = arith.constant 0 : index
    %0 = vector.load %arg3[%c0, %c0_0] : memref<8x128xi32, #tpu.memory_space<vmem>>, vector<8x128xi32>
    %c0_1 = arith.constant 0 : index
    %1 = memref.load %arg1[%c0_1] : memref<1xi32, #tpu.memory_space<smem>>
    %2 = arith.index_cast %1 : i32 to index
    %3 = memref.load %arg2[%2] : memref<8xf32, #tpu.memory_space<smem>>
    %cst = arith.constant 0.000000e+00 : f32
    %4 = vector.broadcast %cst : f32 to vector<8x128xf32>
    %c0_2 = arith.constant 0 : index
    %5 = memref.load %arg2[%c0_2] : memref<8xf32, #tpu.memory_space<smem>>
    %6 = arith.subf %5, %3 : f32
    %c0_i32 = arith.constant 0 : i32
    %7 = vector.broadcast %c0_i32 : i32 to vector<8x128xi32>
    %8 = arith.cmpi eq, %0, %7 : vector<8x128xi32>
    %9 = vector.broadcast %6 : f32 to vector<8x128xf32>
    %10 = arith.select %8, %9, %4 : vector<8x128xi1>, vector<8x128xf32>
    %c1 = arith.constant 1 : index
    %11 = memref.load %arg2[%c1] : memref<8xf32, #tpu.memory_space<smem>>
    %12 = arith.subf %11, %3 : f32
    %c1_i32 = arith.constant 1 : i32
    %13 = vector.broadcast %c1_i32 : i32 to vector<8x128xi32>
    %14 = arith.cmpi eq, %0, %13 : vector<8x128xi32>
    %15 = vector.broadcast %12 : f32 to vector<8x128xf32>
    %16 = arith.select %14, %15, %10 : vector<8x128xi1>, vector<8x128xf32>
    %c2 = arith.constant 2 : index
    %17 = memref.load %arg2[%c2] : memref<8xf32, #tpu.memory_space<smem>>
    %18 = arith.subf %17, %3 : f32
    %c2_i32 = arith.constant 2 : i32
    %19 = vector.broadcast %c2_i32 : i32 to vector<8x128xi32>
    %20 = arith.cmpi eq, %0, %19 : vector<8x128xi32>
    %21 = vector.broadcast %18 : f32 to vector<8x128xf32>
    %22 = arith.select %20, %21, %16 : vector<8x128xi1>, vector<8x128xf32>
    %c3 = arith.constant 3 : index
    %23 = memref.load %arg2[%c3] : memref<8xf32, #tpu.memory_space<smem>>
    %24 = arith.subf %23, %3 : f32
    %c3_i32 = arith.constant 3 : i32
    %25 = vector.broadcast %c3_i32 : i32 to vector<8x128xi32>
    %26 = arith.cmpi eq, %0, %25 : vector<8x128xi32>
    %27 = vector.broadcast %24 : f32 to vector<8x128xf32>
    %28 = arith.select %26, %27, %22 : vector<8x128xi1>, vector<8x128xf32>
    %c4 = arith.constant 4 : index
    %29 = memref.load %arg2[%c4] : memref<8xf32, #tpu.memory_space<smem>>
    %30 = arith.subf %29, %3 : f32
    %c4_i32 = arith.constant 4 : i32
    %31 = vector.broadcast %c4_i32 : i32 to vector<8x128xi32>
    %32 = arith.cmpi eq, %0, %31 : vector<8x128xi32>
    %33 = vector.broadcast %30 : f32 to vector<8x128xf32>
    %34 = arith.select %32, %33, %28 : vector<8x128xi1>, vector<8x128xf32>
    %c5 = arith.constant 5 : index
    %35 = memref.load %arg2[%c5] : memref<8xf32, #tpu.memory_space<smem>>
    %36 = arith.subf %35, %3 : f32
    %c5_i32 = arith.constant 5 : i32
    %37 = vector.broadcast %c5_i32 : i32 to vector<8x128xi32>
    %38 = arith.cmpi eq, %0, %37 : vector<8x128xi32>
    %39 = vector.broadcast %36 : f32 to vector<8x128xf32>
    %40 = arith.select %38, %39, %34 : vector<8x128xi1>, vector<8x128xf32>
    %c6 = arith.constant 6 : index
    %41 = memref.load %arg2[%c6] : memref<8xf32, #tpu.memory_space<smem>>
    %42 = arith.subf %41, %3 : f32
    %c6_i32 = arith.constant 6 : i32
    %43 = vector.broadcast %c6_i32 : i32 to vector<8x128xi32>
    %44 = arith.cmpi eq, %0, %43 : vector<8x128xi32>
    %45 = vector.broadcast %42 : f32 to vector<8x128xf32>
    %46 = arith.select %44, %45, %40 : vector<8x128xi1>, vector<8x128xf32>
    %c7 = arith.constant 7 : index
    %47 = memref.load %arg2[%c7] : memref<8xf32, #tpu.memory_space<smem>>
    %48 = arith.subf %47, %3 : f32
    %c7_i32 = arith.constant 7 : i32
    %49 = vector.broadcast %c7_i32 : i32 to vector<8x128xi32>
    %50 = arith.cmpi eq, %0, %49 : vector<8x128xi32>
    %51 = vector.broadcast %48 : f32 to vector<8x128xf32>
    %52 = arith.select %50, %51, %46 : vector<8x128xi1>, vector<8x128xf32>
    %53 = math.exp2 %52 : vector<8x128xf32>
    %c0_3 = arith.constant 0 : index
    %c0_4 = arith.constant 0 : index
    %54 = vector.load %arg4[%c0_3, %c0_4] : memref<8x128xf32, #tpu.memory_space<vmem>>, vector<8x128xf32>
    tpu.vector_store %arg4[%c0_3, %c0_4], %53 {strides = array<i32>} : memref<8x128xf32, #tpu.memory_space<vmem>>, vector<8x128xf32>,
    return
  }
  func.func @transform_0(%arg0: i32) -> i32 {
    %c0_i32 = arith.constant 0 : i32
    %c0_i32_0 = arith.constant 0 : i32
    return %c0_i32 : i32
  }
  func.func @transform_1(%arg0: i32) -> i32 {
    %c0_i32 = arith.constant 0 : i32
    %c0_i32_0 = arith.constant 0 : i32
    return %c0_i32 : i32
  }
  func.func @transform_2(%arg0: i32) -> (i32, i32) {
    %c0_i32 = arith.constant 0 : i32
    %c0_i32_0 = arith.constant 0 : i32
    return %arg0, %c0_i32 : i32, i32
  }
  func.func @transform_3(%arg0: i32) -> (i32, i32) {
    %c0_i32 = arith.constant 0 : i32
    %c0_i32_0 = arith.constant 0 : i32
    return %arg0, %c0_i32 : i32, i32
  }
}

</mosaic_0001>

<bundles_post_ra>
// kernel: tpu_custom_call.1
= control target key start
LH: loop header
LB: loop body
LE: loop exit
PB: predicated region body
PF: predicated region fallthrough
CT: control target
= control target key end

     0   :  { %9 = vsyncpa [#allocation6], 0  ;;  %s229_s0 = inlined_call_operand.<no memory space> [shape: s32[1], index: 0, kind: input, shape index: {}]   ;;  %s230_s1 = inlined_call_operand.vmem [shape: f32[8], index: 1, kind: input, shape index: {}]   ;;  %s231_s2 = inlined_call_operand.hbm [shape: s32[8,128], index: 2, kind: input, shape index: {}]   ;;  %s232_s3 = inlined_call_operand.hbm [shape: f32[8,128], index: 3, kind: output, shape index: {}]  }
   0x1   :  { %10 = vsyncpa [#allocation4], 0 }
   0x2   :  { %11 = vsyncpa [#allocation5], 0  ;;  %s19_s14 = sshll.u32 %s230_s1, 4  ;;  %s28_s17 = sshll.u32 %s231_s2, 4  ;;  %s20_s14 = int_to_ptr.vmem [resolvable:$true] %s19_s14  ;;  %s29_s17 = int_to_ptr.hbm [resolvable:$true] %s28_s17 }
   0x3   :  { %s184_s18 = smov [#allocation3]   ;;  %s185_s19 = smov [#allocation7]  }
   0x4   :  { %22 = dma.vmem_to_smem %s20_s14, 16, %s184_s18, [#allocation6]  }
   0x5   :  { %s30_s20 = sshll.u32 %s185_s19, 4  ;;  %s31_s20 = int_to_ptr.vmem [resolvable:$true] %s30_s20 }
   0x6   :  { %33 = dma.hbm_to_vmem [thread:$0]  %s29_s17, 128, %s31_s20, [#allocation4]  }
   0x7   :  { %178 = dma.done.wait [#allocation6], 16  }
   0x8   :  { %179 = vsyncadd [#allocation6], 4294967280 }
   0x9   :  { %180 = dma.done.wait [#allocation4], 128  }
   0xa   :  { %181 = vsyncadd [#allocation4], 4294967168 }
   0xb   :  { %42 = sfence }
   0xc   :  { %s216_s1 = sld [smem:[#allocation3 + %s229_s0]]  ;;  %v43_v0 = vld [vmem:[#allocation7] sm:$0xff]  ;;  %s186_s10 = smov [#allocation8]  }
   0xd   :  { %s46_s2 = sld [smem:[#allocation3]]  ;;  %vm48_vm0 = vcmp.eq.s32.totalorder %v43_v0, 0  ;;  %vm53_vm1 = vcmp.eq.s32.totalorder %v43_v0, 1  ;;  %vm58_vm2 = vcmp.eq.s32.totalorder %v43_v0, 2  ;;  %vm63_vm3 = vcmp.eq.s32.totalorder %v43_v0, 3  ;;  %s93_s11 = sshll.u32 %s186_s10, 4  ;;  %s94_s11 = int_to_ptr.vmem [resolvable:$true] %s93_s11 }
   0xe   :  { %s106_s23 = sld [smem:[#allocation3 + $0x1]]  ;;  %vm68_vm4 = vcmp.eq.s32.totalorder %v43_v0, 4  ;;  %vm73_vm5 = vcmp.eq.s32.totalorder %v43_v0, 5  ;;  %vm78_vm6 = vcmp.eq.s32.totalorder %v43_v0, 6  ;;  %vm83_vm7 = vcmp.eq.s32.totalorder %v43_v0, 7  ;;  %s95_s14 = sshll.u32 %s232_s3, 4  ;;  %s96_s14 = int_to_ptr.hbm [resolvable:$true] %s95_s14 }
   0xf   :  { %s107_s24 = sld [smem:[#allocation3 + $0x2]] }
  0x10   :  { %s108_s25 = sld [smem:[#allocation3 + $0x3]] }
  0x11   :  { %s109_s26 = sld [smem:[#allocation3 + $0x4]] }
  0x12   :  { %s110_s27 = sld [smem:[#allocation3 + $0x5]] }
  0x13   :  { %s47_s28 = ssub.f32 %s46_s2, %s216_s1 }
  0x14   :  { %s52_s29 = ssub.f32 %s106_s23, %s216_s1 }
  0x15   :  { %v49_v1 = vstv %s47_s28  ;;  %s57_s0 = ssub.f32 %s107_s24, %s216_s1 }
  0x16   :  { %v50_v2 = vsel %vm48_vm0, %v49_v1, 0.0  ;;  %v54_v3 = vstv %s52_s29  ;;  %s62_s30 = ssub.f32 %s108_s25, %s216_s1 }
  0x17   :  { %v55_v4 = vsel %vm53_vm1, %v54_v3, %v50_v2  ;;  %v59_v5 = vstv %s57_s0  ;;  %s67_s4 = ssub.f32 %s109_s26, %s216_s1 }
  0x18   :  { %v60_v6 = vsel %vm58_vm2, %v59_v5, %v55_v4  ;;  %v64_v7 = vstv %s62_s30  ;;  %s72_s5 = ssub.f32 %s110_s27, %s216_s1 }
  0x19   :  { %v65_v8 = vsel %vm63_vm3, %v64_v7, %v60_v6  ;;  %v69_v9 = vstv %s67_s4  ;;  %s111_s6 = sld [smem:[#allocation3 + $0x6]] }
  0x1a   :  { %s112_s7 = sld [smem:[#allocation3 + $0x7]]  ;;  %v70_v10 = vsel %vm68_vm4, %v69_v9, %v65_v8  ;;  %v74_v11 = vstv %s72_s5 }
  0x1b   :  { %v75_v12 = vsel %vm73_vm5, %v74_v11, %v70_v10 }
  0x1f   :  { %s77_s8 = ssub.f32 %s111_s6, %s216_s1 }
  0x20   :  { %s82_s9 = ssub.f32 %s112_s7, %s216_s1 }
  0x21   :  { %v79_v13 = vstv %s77_s8 }
  0x22   :  { %v80_v14 = vsel %vm78_vm6, %v79_v13, %v75_v12  ;;  %v84_v15 = vstv %s82_s9 }
  0x23   :  { %v85_v16 = vsel %vm83_vm7, %v84_v15, %v80_v14 }
  0x24   :  { %116 = vpow2.f32 %v85_v16 }
  0x2a   :  { %v117_v17 = vpop.eup %116 }
  0x2b   :  { %87 = vst [vmem:[#allocation8] sm:$0xff] %v117_v17 }
  0x2c   :  { %98 = dma.vmem_to_hbm [thread:$0]  %s94_s11, 128, %s96_s14, [#allocation5]  }
  0x2d   :  { %182 = dma.done.wait [#allocation5], 128  }
  0x2e   :  { %183 = vsyncadd [#allocation5], 4294967168 }
  0x2f   :  { %103 = vsyncpa [#allocation4], 1 }
  0x30   :  { %104 = vsyncpa [#allocation5], 1 }
  0x31   :  { %105 = vsyncpa [#allocation6], 1 }

</bundles_post_ra>
